<compile_context>
chip_gen: v7x
topology: tpu7x:2x2x1
jax: 0.10.0
libtpu: 0.0.40
codegen_flags: <defaults>
</compile_context>

<pallas_src>
import functools

import jax
import jax.numpy as jnp
from jax.experimental import pallas as pl
from jax.experimental.pallas import tpu as pltpu


def _round_up(x, m):
    return ((x + m - 1) // m) * m


def _head_kernel(x_ref, w_ref, b_ref, o_ref, acc_ref, *, inv_hw):
    # x_ref:   [tn, tc, HW]          native-layout feature-map tile
    # w_ref:   [c_tiles, tc, ncp]    full classifier weight, VMEM-resident
    # b_ref:   [1, ncp]
    # o_ref:   [tn, ncp]
    # acc_ref: [tn, ncp] f32         persists across the channel (j) axis
    j = pl.program_id(1)

    @pl.when(j == 0)
    def _init():
        acc_ref[...] = jnp.zeros_like(acc_ref)

    # Global average pool: spatial *sum* over the lane axis in the input dtype
    # (the 1/HW is folded in once at finalize); only the pooled tile is cast.
    xs = jnp.sum(x_ref[...], axis=-1)                      # [tn, tc]
    w_tile = w_ref[j]                                      # [tc, ncp]
    acc_ref[...] += jnp.dot(xs.astype(w_tile.dtype), w_tile,
                            preferred_element_type=jnp.float32)

    # nn.Dropout() at inference time is the identity -> nothing to do.

    @pl.when(j == pl.num_programs(1) - 1)
    def _finalize():
        o_ref[...] = (acc_ref[...] * inv_hw
                      + b_ref[...].astype(jnp.float32)).astype(o_ref.dtype)


def se154_head(x, weight, bias, *, tile_n=128, tile_c=512):
    """Global avg-pool + dropout(identity) + last_linear.

    x:      [N, C, H, W]      backbone feature map (f32 or bf16 — used as-is)
    weight: [C, num_classes]  (f32 or bf16 — used as-is on the MXU)
    bias:   [num_classes]
    returns [N, num_classes]  float32 logits.
    """
    N, C, H, W = x.shape
    HW = H * W
    num_classes = weight.shape[1]

    # Free reshape only — no transpose, no extra HBM pass over the feature map.
    x3 = x.reshape(N, C, HW)

    # ---- batch tiling: never pad the feature map; Pallas masks the ragged tail.
    n_tiles = pl.cdiv(N, tile_n)
    if N >= 16:
        n_tiles = max(n_tiles, 2)          # keep both TensorCores busy on v7x
    if n_tiles == 1:
        tn = N
    else:
        tn = _round_up(pl.cdiv(N, n_tiles), 8)
        n_tiles = pl.cdiv(N, tn)

    # ---- classes: lane-dense padded output (unmasked stores, full MXU tiles).
    ncp = max(128, _round_up(num_classes, 128))

    # ---- channel tile from a VMEM budget (adapts to v5e/v6e 128MiB vs v7x 64MiB).
    try:
        vmem_cap = int(getattr(pltpu.get_tpu_info(), "vmem_capacity_bytes",
                               64 * 1024 * 1024))
    except Exception:
        vmem_cap = 64 * 1024 * 1024

    x_item = jnp.dtype(x.dtype).itemsize
    w_item = jnp.dtype(weight.dtype).itemsize
    x_sub = {4: 8, 2: 16, 1: 32}.get(x_item, 8)
    lanes = _round_up(HW, 128)             # lane padding of the (tc, HW) tile

    def vmem_est(tc_):
        x_buf = 2 * tn * _round_up(tc_, x_sub) * lanes * x_item   # 2x-buffered x
        w_buf = 2 * C * ncp * w_item                              # resident weight
        io = 3 * tn * ncp * 4                                     # f32 acc + 2x out
        return x_buf + w_buf + io + (1 << 20)

    cands = [d for d in range(8, min(C, tile_c) + 1, 8) if C % d == 0]
    if not cands:
        cands = [C]                                               # tiny / odd C
    tc = cands[0]
    budget = int(0.55 * vmem_cap)
    for d in cands:
        if vmem_est(d) <= budget:
            tc = d
    if C % tc != 0:
        tc = C
    c_tiles = C // tc

    # ---- classifier params: pad classes, reshape weight for per-tile indexing.
    if ncp != num_classes:
        w_p = jnp.pad(weight, ((0, 0), (0, ncp - num_classes)))
        b_p = jnp.pad(bias, (0, ncp - num_classes))
    else:
        w_p, b_p = weight, bias
    w_p = w_p.reshape(c_tiles, tc, ncp)
    b_p = b_p.reshape(1, ncp)

    grid = (n_tiles, c_tiles)

    cost = pl.CostEstimate(
        flops=2 * N * C * ncp + N * C * HW,
        transcendentals=0,
        bytes_accessed=(x3.size * x_item
                        + w_p.size * w_item
                        + b_p.size * jnp.dtype(b_p.dtype).itemsize
                        + N * ncp * 4),
    )

    vmem_limit = int(min(0.9 * vmem_cap,
                         max(32 * 1024 * 1024, 1.3 * vmem_est(tc) + (2 << 20))))

    out = pl.pallas_call(
        functools.partial(_head_kernel, inv_hw=1.0 / HW),
        out_shape=jax.ShapeDtypeStruct((N, ncp), jnp.float32),
        grid_spec=pltpu.PrefetchScalarGridSpec(
            num_scalar_prefetch=0,
            grid=grid,
            in_specs=[
                # Native-layout tile: channels on sublanes, spatial on lanes.
                pl.BlockSpec((tn, tc, HW), lambda i, j: (i, j, 0)),
                # Full weight, constant block index -> DMA'd exactly once.
                pl.BlockSpec((c_tiles, tc, ncp), lambda i, j: (0, 0, 0)),
                pl.BlockSpec((1, ncp), lambda i, j: (0, 0)),
            ],
            out_specs=pl.BlockSpec((tn, ncp), lambda i, j: (i, 0)),
            scratch_shapes=[pltpu.VMEM((tn, ncp), jnp.float32)],
        ),
        compiler_params=pltpu.CompilerParams(
            dimension_semantics=("parallel", "arbitrary"),
            vmem_limit_bytes=vmem_limit,
        ),
        cost_estimate=cost,
    )(x3, w_p, b_p)

    return out[:, :num_classes]


def reference_head(x, weight, bias):
    # Pure-JAX reference: avg_pool2d over the full spatial extent, flatten, linear.
    pooled = jnp.mean(x.astype(jnp.float32), axis=(2, 3))           # [N, C]
    return pooled @ weight.astype(jnp.float32) + bias.astype(jnp.float32)[None, :]


if __name__ == "__main__":
    # Small shapes consistent with the module's forward tail:
    #   batch=2, feature channels C=32 (stand-in for senet154's 2048),
    #   spatial 16x16, num_classes=5 (module default).
    N, C, H, W = 2, 32, 16, 16
    NUM_CLASSES = 5

    key = jax.random.PRNGKey(0)
    kx, kw, kb = jax.random.split(key, 3)

    x = jax.random.normal(kx, (N, C, H, W), dtype=jnp.float32)
    bound = 1.0 / (C ** 0.5)
    weight = jax.random.uniform(kw, (C, NUM_CLASSES), minval=-bound, maxval=bound,
                                dtype=jnp.float32)
    bias = jax.random.uniform(kb, (NUM_CLASSES,), minval=-bound, maxval=bound,
                              dtype=jnp.float32)

    # f32 path (single tile).
    out = jax.block_until_ready(se154_head(x, weight, bias))
    ref = reference_head(x, weight, bias)
    assert out.shape == (N, NUM_CLASSES)
    assert jnp.allclose(out, ref, atol=1e-4, rtol=1e-4), (out, ref)

    # Tiled path: ragged batch (N not a tile multiple), C > tile_c (channel
    # accumulation across grid steps), HW not a multiple of 128.
    N2, C2, H2, W2, NC2 = 18, 96, 5, 5, 7
    k1, k2, k3 = jax.random.split(jax.random.PRNGKey(1), 3)
    x2 = jax.random.normal(k1, (N2, C2, H2, W2), dtype=jnp.float32)
    w2 = jax.random.uniform(k2, (C2, NC2), minval=-0.1, maxval=0.1, dtype=jnp.float32)
    b2 = jax.random.uniform(k3, (NC2,), minval=-0.1, maxval=0.1, dtype=jnp.float32)
    out2 = jax.block_until_ready(se154_head(x2, w2, b2, tile_n=8, tile_c=32))
    ref2 = reference_head(x2, w2, b2)
    assert out2.shape == (N2, NC2)
    assert jnp.allclose(out2, ref2, atol=5e-4, rtol=5e-4), (out2, ref2)

    # bf16 feature map + bf16 classifier weight (native MXU rate, half the DMA);
    # f32 accumulation inside the kernel -> bf16-level tolerance vs f32 reference.
    x_bf = x.astype(jnp.bfloat16)
    w_bf = weight.astype(jnp.bfloat16)
    out_bf = jax.block_until_ready(se154_head(x_bf, w_bf, bias))
    ref_bf = reference_head(x_bf, w_bf, bias)
    assert jnp.allclose(out_bf, ref_bf, atol=5e-2, rtol=5e-2), (out_bf, ref_bf)

    print("KERNEL_OK")
</pallas_src>

<mosaic_0001>
module attributes {stable_mosaic.version = 11 : i64} {
  func.func @_head_kernel(%arg0: i32, %arg1: i32, %arg2: memref<2x32x256xf32, #tpu.memory_space<vmem>>, %arg3: memref<1x32x128xf32, #tpu.memory_space<vmem>>, %arg4: memref<1x128xf32, #tpu.memory_space<vmem>>, %arg5: memref<2x128xf32, #tpu.memory_space<vmem>>, %arg6: memref<2x128xf32, #tpu.memory_space<vmem>>) attributes {dimension_semantics = [#tpu.dimension_semantics<parallel>, #tpu.dimension_semantics<arbitrary>], iteration_bounds = array<i64: 1, 1>, scalar_prefetch = 0 : i64, scratch_operands = 1 : i64, tpu.core_type = #tpu.core_type<tc>, window_params = [{transform_indices = @transform_0, window_bounds = array<i64: 2, 32, 256>}, {pipeline_mode = #tpu.pipeline_mode<synchronous>, transform_indices = @transform_1, window_bounds = array<i64: 1, 32, 128>}, {pipeline_mode = #tpu.pipeline_mode<synchronous>, transform_indices = @transform_2, window_bounds = array<i64: 1, 128>}, {transform_indices = @transform_3, window_bounds = array<i64: 2, 128>}]} {
    %c0_i32 = arith.constant 0 : i32
    %0 = arith.cmpi eq, %arg1, %c0_i32 : i32
    %1 = arith.extui %0 : i1 to i32
    %c0_i32_0 = arith.constant 0 : i32
    %2 = arith.cmpi ne, %1, %c0_i32_0 : i32
    scf.if %2 {
      %cst_12 = arith.constant 0.000000e+00 : f32
      %15 = vector.broadcast %cst_12 : f32 to vector<2x128xf32>
      %c0_13 = arith.constant 0 : index
      %c0_14 = arith.constant 0 : index
      %16 = vector.load %arg6[%c0_13, %c0_14] : memref<2x128xf32, #tpu.memory_space<vmem>>, vector<2x128xf32>
      tpu.vector_store %arg6[%c0_13, %c0_14], %15 {strides = array<i32>} : memref<2x128xf32, #tpu.memory_space<vmem>>, vector<2x128xf32>,
    } else {
    }
    %c0 = arith.constant 0 : index
    %c0_1 = arith.constant 0 : index
    %c0_2 = arith.constant 0 : index
    %3 = vector.load %arg2[%c0, %c0_1, %c0_2] : memref<2x32x256xf32, #tpu.memory_space<vmem>>, vector<2x32x256xf32>
    %cst = arith.constant dense<0.000000e+00> : vector<2x32xf32>
    %4 = vector.multi_reduction <add>, %3, %cst [2] : vector<2x32x256xf32> to vector<2x32xf32>
    %5 = arith.index_cast %arg1 : i32 to index
    %c0_3 = arith.constant 0 : index
    %c0_4 = arith.constant 0 : index
    %6 = vector.load %arg3[%5, %c0_3, %c0_4] : memref<1x32x128xf32, #tpu.memory_space<vmem>>, vector<1x32x128xf32>
    %7 = vector.shape_cast %6 : vector<1x32x128xf32> to vector<32x128xf32>
    %c0_5 = arith.constant 0 : index
    %c0_6 = arith.constant 0 : index
    %8 = vector.load %arg6[%c0_5, %c0_6] : memref<2x128xf32, #tpu.memory_space<vmem>>, vector<2x128xf32>
    %cst_7 = arith.constant dense<0.000000e+00> : vector<2x128xf32>
    %9 = tpu.matmul %4, %7, %cst_7 {dimension_numbers = #tpu.dot_dimension_numbers<[1], [0], [0], [1], [0, 0, 1, 1], [], []>} : vector<2x32xf32>, vector<32x128xf32>, vector<2x128xf32> -> vector<2x128xf32>
    %10 = arith.addf %8, %9 : vector<2x128xf32>
    %c0_8 = arith.constant 0 : index
    %c0_9 = arith.constant 0 : index
    %11 = vector.load %arg6[%c0_8, %c0_9] : memref<2x128xf32, #tpu.memory_space<vmem>>, vector<2x128xf32>
    tpu.vector_store %arg6[%c0_8, %c0_9], %10 {strides = array<i32>} : memref<2x128xf32, #tpu.memory_space<vmem>>, vector<2x128xf32>,
    %c0_i32_10 = arith.constant 0 : i32
    %12 = arith.cmpi eq, %arg1, %c0_i32_10 : i32
    %13 = arith.extui %12 : i1 to i32
    %c0_i32_11 = arith.constant 0 : i32
    %14 = arith.cmpi ne, %13, %c0_i32_11 : i32
    scf.if %14 {
      %c0_12 = arith.constant 0 : index
      %c0_13 = arith.constant 0 : index
      %15 = vector.load %arg6[%c0_12, %c0_13] : memref<2x128xf32, #tpu.memory_space<vmem>>, vector<2x128xf32>
      %cst_14 = arith.constant 3.906250e-03 : f32
      %16 = vector.broadcast %cst_14 : f32 to vector<2x128xf32>
      %17 = arith.mulf %15, %16 : vector<2x128xf32>
      %c0_15 = arith.constant 0 : index
      %c0_16 = arith.constant 0 : index
      %18 = vector.load %arg4[%c0_15, %c0_16] : memref<1x128xf32, #tpu.memory_space<vmem>>, vector<1x128xf32>
      %19 = vector.broadcast %18 : vector<1x128xf32> to vector<2x128xf32>
      %20 = arith.addf %17, %19 : vector<2x128xf32>
      %c0_17 = arith.constant 0 : index
      %c0_18 = arith.constant 0 : index
      %21 = vector.load %arg5[%c0_17, %c0_18] : memref<2x128xf32, #tpu.memory_space<vmem>>, vector<2x128xf32>
      tpu.vector_store %arg5[%c0_17, %c0_18], %20 {strides = array<i32>} : memref<2x128xf32, #tpu.memory_space<vmem>>, vector<2x128xf32>,
    } else {
    }
    return
  }
  func.func @transform_0(%arg0: i32, %arg1: i32) -> (i32, i32, i32) {
    %c0_i32 = arith.constant 0 : i32
    %c0_i32_0 = arith.constant 0 : i32
    return %arg0, %arg1, %c0_i32 : i32, i32, i32
  }
  func.func @transform_1(%arg0: i32, %arg1: i32) -> (i32, i32, i32) {
    %c0_i32 = arith.constant 0 : i32
    %c0_i32_0 = arith.constant 0 : i32
    %c0_i32_1 = arith.constant 0 : i32
    %c0_i32_2 = arith.constant 0 : i32
    return %c0_i32, %c0_i32_0, %c0_i32_1 : i32, i32, i32
  }
  func.func @transform_2(%arg0: i32, %arg1: i32) -> (i32, i32) {
    %c0_i32 = arith.constant 0 : i32
    %c0_i32_0 = arith.constant 0 : i32
    %c0_i32_1 = arith.constant 0 : i32
    return %c0_i32, %c0_i32_0 : i32, i32
  }
  func.func @transform_3(%arg0: i32, %arg1: i32) -> (i32, i32) {
    %c0_i32 = arith.constant 0 : i32
    %c0_i32_0 = arith.constant 0 : i32
    return %arg0, %c0_i32 : i32, i32
  }
}

</mosaic_0001>

<bundles_post_ra>
// kernel: tpu_custom_call.1
= control target key start
LH: loop header
LB: loop body
LE: loop exit
PB: predicated region body
PF: predicated region fallthrough
CT: control target
= control target key end

     0   :  { %8 = vsyncpa [#allocation4], 0  ;;  %s431_s0 = inlined_call_operand.hbm [shape: f32[2,32,256], index: 0, kind: input, shape index: {}]   ;;  %s432_s1 = inlined_call_operand.hbm [shape: f32[1,32,128], index: 1, kind: input, shape index: {}]   ;;  %s433_s2 = inlined_call_operand.vmem [shape: f32[1,128], index: 2, kind: input, shape index: {}]   ;;  %s434_s3 = inlined_call_operand.hbm [shape: f32[2,128], index: 3, kind: output, shape index: {}]  }
   0x1   :  { %9 = vsyncpa [#allocation7], 0 }
   0x2   :  { %10 = vsyncpa [#allocation5], 0  ;;  %s362_s12 = smov [#allocation3]   ;;  %s290_s16 = scalar_lea.hbm %s431_s0, 2048 }
   0x3   :  { %s16_s13 = sshll.u32 %s362_s12, 4  ;;  %p291_p0 = scmp.ne.s32.totalorder %s431_s0, %s290_s16  ;;  %s17_s13 = int_to_ptr.vmem [resolvable:$true] %s16_s13 }
   0x4   :  { %p294_p1 = scmp.lt.u32.totalorder %s290_s16, %s431_s0 }
   0x6   :  { %p296_p2 = pnand %p294_p1, %p291_p0 }
   0x8   :  { %299 = shalt.err (!%p296_p2)
}
   0x9   :  { %s300_s21 = scalar_lea.vmem %s17_s13, 2048  ;;  %p305_p4 = scmp.lt.s32.totalorder %s17_s13, %s17_s13 }
   0xa   :  { %p301_p3 = scmp.ne.s32.totalorder %s17_s13, %s300_s21  ;;  %p306_p5 = scmp.lt.s32.totalorder %s300_s21, %s300_s21 }
   0xc   :  { %p307_p6 = por %p306_p5, %p305_p4 }
   0xe   :  { %p308_p7 = pnand %p307_p6, %p301_p3 }
  0x10   :  { %311 = shalt.err (!%p308_p7)
}
  0x11   :  { %s363_s22 = smov 256   ;;  %s364_s23 = smov 16  }
  0x12   :  { %22 = dma.hbm_to_vmem [thread:$0]  %s431_s0, 2048, %s17_s13, [#allocation4], %s363_s22, %s363_s22, %s364_s23  }
  0x13   :  { %s365_s26 = smov [#allocation6]   ;;  %s312_s30 = scalar_lea.hbm %s432_s1, 512 }
  0x14   :  { %s28_s27 = sshll.u32 %s365_s26, 4  ;;  %p313_p8 = scmp.ne.s32.totalorder %s432_s1, %s312_s30  ;;  %s29_s27 = int_to_ptr.vmem [resolvable:$true] %s28_s27 }
  0x15   :  { %p316_p9 = scmp.lt.u32.totalorder %s312_s30, %s432_s1 }
  0x17   :  { %p318_p10 = pnand %p316_p9, %p313_p8 }
  0x19   :  { %321 = shalt.err (!%p318_p10)
}
  0x1a   :  { %s322_s8 = scalar_lea.vmem %s29_s27, 512  ;;  %p327_p12 = scmp.lt.s32.totalorder %s29_s27, %s29_s27 }
  0x1b   :  { %p323_p11 = scmp.ne.s32.totalorder %s29_s27, %s322_s8  ;;  %p328_p13 = scmp.lt.s32.totalorder %s322_s8, %s322_s8 }
  0x1d   :  { %p329_p0 = por %p328_p13, %p327_p12 }
  0x1f   :  { %p330_p1 = pnand %p329_p0, %p323_p11 }
  0x21   :  { %333 = shalt.err (!%p330_p1)
}
  0x22   :  { %s366_s0 = smov 128   ;;  %s367_s9 = smov 8  }
  0x23   :  { %34 = dma.hbm_to_vmem [thread:$0]  %s432_s1, 512, %s29_s27, [#allocation7], %s366_s0, %s366_s0, %s367_s9  }
  0x24   :  { %356 = dma.done.wait [#allocation4], 2048  }
  0x25   :  { %357 = vsyncadd [#allocation4], 4294965248 }
  0x26   :  { %358 = dma.done.wait [#allocation7], 512  }
  0x27   :  { %359 = vsyncadd [#allocation7], 4294966784  ;;  %v56_v0 = vld [vmem:[#allocation3 + $0x40] sm:$0xff]  ;;  %v57_v1 = vld [vmem:[#allocation3 + $0x48] sm:$0xff]  ;;  %v368_v27 = vmov 0.0|0.0   ;;  %v369_v31 = vmov 0.0   ;;  %v103_v32 = vlaneseq }
  0x28   :  { %v48_v2 = vld [vmem:[#allocation3] sm:$0xff]  ;;  %v76_v3 = vadd.f32 %v57_v1, %v56_v0  ;;  %v49_v4 = vld [vmem:[#allocation3 + $0x8] sm:$0xff]  ;;  %v58_v5 = vld [vmem:[#allocation3 + $0x50] sm:$0xff]  ;;  %274 = vmatprep.subr.bf16.mxu0 %v368_v27  ;;  %47 = vst [vmem:[#allocation2] sm:$0x3] %v369_v31  ;;  %vm370_vm0 = vmmov 0  }
  0x29   :  { %v59_v6 = vld [vmem:[#allocation3 + $0x58] sm:$0xff]  ;;  %v64_v7 = vadd.f32 %v49_v4, %v48_v2  ;;  %v50_v8 = vld [vmem:[#allocation3 + $0x10] sm:$0xff]  ;;  %v60_v12 = vld [vmem:[#allocation3 + $0x60] sm:$0xff]  ;;  %271 = vmatprep.mubr.msk.f32.mxu0 %vm370_vm0, %v369_v31  ;;  %v104_v33 = vand.u32 127, %v103_v32  ;;  %v106_v38 = vshrl.u32 %v103_v32, 7  ;;  %vm114_vm1 = vcmask 130112  }
  0x2a   :  { %v51_v9 = vld [vmem:[#allocation3 + $0x18] sm:$0xff]  ;;  %77 = vadd.xlane.f32.xlu1 %v76_v3  ;;  %v79_v10 = vadd.f32 %v59_v6, %v58_v5  ;;  %v61_v13 = vld [vmem:[#allocation3 + $0x68] sm:$0xff]  ;;  %v52_v14 = vld [vmem:[#allocation3 + $0x20] sm:$0xff]  ;;  %vm121_vm2 = vcmask 195712   ;;  %vm128_vm3 = vcmask 261312   ;;  %vm149_vm4 = vcmask 1041409  }
  0x2b   :  { %65 = vadd.xlane.f32.xlu0 %v64_v7  ;;  %v67_v11 = vadd.f32 %v51_v9, %v50_v8  ;;  %v53_v15 = vld [vmem:[#allocation3 + $0x28] sm:$0xff]  ;;  %v82_v16 = vadd.f32 %v61_v13, %v60_v12  ;;  %v62_v18 = vld [vmem:[#allocation3 + $0x70] sm:$0xff]  ;;  %v63_v19 = vld [vmem:[#allocation3 + $0x78] sm:$0xff]  ;;  %v109_v36 = vadd.s32 4294967288, %v104_v33  ;;  %v116_v37 = vadd.s32 4294967280, %v104_v33  ;;  %s371_s13 = smov [#allocation8]  }
  0x2c   :  { %v70_v17 = vadd.f32 %v53_v15, %v52_v14  ;;  %v54_v20 = vld [vmem:[#allocation3 + $0x30] sm:$0xff]  ;;  %v55_v21 = vld [vmem:[#allocation3 + $0x38] sm:$0xff]  ;;  %v85_v22 = vadd.f32 %v63_v19, %v62_v18  ;;  %v90_v24 = vld [vmem:[#allocation6] sm:$0xff]  ;;  %v123_v42 = vadd.s32 4294967272, %v104_v33  ;;  %v107_v44 = vsub.s32 %v104_v33, %v106_v38  ;;  %s246_s14 = sshll.u32 %s371_s13, 4  ;;  %s247_s14 = int_to_ptr.vmem [resolvable:$true] %s246_s14 }
  0x2d   :  { %v73_v23 = vadd.f32 %v55_v21, %v54_v20  ;;  %v91_v25 = vld [vmem:[#allocation6 + $0x8] sm:$0xff]  ;;  %v92_v28 = vld [vmem:[#allocation6 + $0x10] sm:$0xff]  ;;  %v93_v29 = vld [vmem:[#allocation6 + $0x18] sm:$0xff]  ;;  %v112_v40 = vsub.s32 %v109_v36, %v106_v38  ;;  %v119_v43 = vsub.s32 %v116_v37, %v106_v38  ;;  %vm151_vm5 = vcmask 261120   ;;  %s334_s15 = scalar_lea.vmem %s247_s14, 32  ;;  %p339_p3 = scmp.lt.s32.totalorder %s247_s14, %s247_s14 }
  0x2e   :  { %80 = vadd.xlane.f32.xlu1 %v79_v10  ;;  %v275_v26 = vpack.c.bf16 %v91_v25, %v90_v24  ;;  %v278_v30 = vpack.c.bf16 %v93_v29, %v92_v28  ;;  %v126_v48 = vsub.s32 %v123_v42, %v106_v38  ;;  %v257_v6 = vld [vmem:[%s433_s2] ss:$0 sm:$0xff]  ;;  %p335_p2 = scmp.ne.s32.totalorder %s247_s14, %s334_s15  ;;  %p340_p4 = scmp.lt.s32.totalorder %s334_s15, %s334_s15 }
  0x2f   :  { %68 = vadd.xlane.f32.xlu0 %v67_v11  ;;  %v94_v1 = vld [vmem:[#allocation2] sm:$0x3] }
  0x30   :  { %276 = vmatpush3.bf16.msra.mxu0 %v275_v26  ;;  %p341_p5 = por %p340_p4, %p339_p3 }
  0x31   :  { %277 = vmatprep.subr.bf16.mxu0 %v368_v27 }
  0x32   :  { %83 = vadd.xlane.f32.xlu1 %v82_v16  ;;  %p342_p6 = pnand %p341_p5, %p335_p2 }
  0x33   :  { %71 = vadd.xlane.f32.xlu0 %v70_v17 }
  0x34   :  { %279 = vmatpush3.bf16.msra.mxu0 %v278_v30 }
  0x36   :  { %86 = vadd.xlane.f32.xlu1 %v85_v22 }
  0x37   :  { %74 = vadd.xlane.f32.xlu0 %v73_v23 }
  0xb7   :  { %v78_v34 = vpop.xlane.xlu1 %77 }
  0xb8   :  { %v66_v35 = vpop.xlane.xlu0 %65  ;;  %v133_v51 = vrot.slane %v78_v34, %v107_v44 }
  0xb9   :  { %v108_v53 = vrot.slane %v66_v35, %v107_v44 }
  0xbb   :  { %v81_v39 = vpop.xlane.xlu1 %80 }
  0xbc   :  { %v69_v41 = vpop.xlane.xlu0 %68  ;;  %v137_v46 = vrot.slane %v81_v39, %v112_v40 }
  0xbd   :  { %v113_v49 = vrot.slane %v69_v41, %v112_v40 }
  0xbe   :  { %v138_v55 = vsel %vm114_vm1, %v137_v46, %v133_v51 }
  0xbf   :  { %v84_v45 = vpop.xlane.xlu1 %83  ;;  %v115_v58 = vsel %vm114_vm1, %v113_v49, %v108_v53 }
  0xc0   :  { %v72_v47 = vpop.xlane.xlu0 %71  ;;  %v142_v50 = vrot.slane %v84_v45, %v119_v43 }
  0xc1   :  { %v120_v52 = vrot.slane %v72_v47, %v119_v43 }
  0xc2   :  { %v143_v59 = vsel %vm121_vm2, %v142_v50, %v138_v55 }
  0xc3   :  { %v87_v54 = vpop.xlane.xlu1 %86  ;;  %v122_v61 = vsel %vm121_vm2, %v120_v52, %v115_v58 }
  0xc4   :  { %v147_v56 = vrot.slane %v87_v54, %v126_v48  ;;  %v75_v57 = vpop.xlane.xlu0 %74 }
  0xc5   :  { %v127_v60 = vrot.slane %v75_v57, %v126_v48 }
  0xc6   :  { %v148_v62 = vsel %vm128_vm3, %v147_v56, %v143_v59 }
  0xc7   :  { %v129_v63 = vsel %vm128_vm3, %v127_v60, %v122_v61 }
  0xc8   :  { %v150_v0 = vsel %vm149_vm4, %v148_v62, %v129_v63 }
  0xc9   :  { %272 = vmatmul.mubr.msk.f32.vlgmr.msra.gmra.mrb[0].mxu0 %vm151_vm5, %v150_v0 }
 0x19c   :  { %v220_v2 = vpop.f32.mrb[0].mxu0 }
 0x19d   :  { %v224_v3 = vadd.f32 %v220_v2, %v94_v1  ;;  %v273_v4 = vpop.f32.mrb[1].mxu0 }
 0x19f   :  { %225 = vst [vmem:[#allocation2] sm:$0x3] %v224_v3 }
 0x1a6   :  { %v229_v5 = vld [vmem:[#allocation2] sm:$0x3] }
 0x1a7   :  { %v230_v7 = vmul.f32 0.00390625, %v229_v5 }
 0x1a9   :  { %v238_v8 = vadd.f32 %v257_v6, %v230_v7 }
 0x1ab   :  { %239 = vst [vmem:[#allocation8] sm:$0x3] %v238_v8 }
 0x1ac   :  { %345 = shalt.err (!%p342_p6)
}
 0x1ad   :  { %s346_s18 = scalar_lea.hbm %s434_s3, 32 }
 0x1ae   :  { %p347_p7 = scmp.ne.s32.totalorder %s434_s3, %s346_s18  ;;  %p350_p8 = scmp.lt.u32.totalorder %s346_s18, %s434_s3 }
 0x1b0   :  { %p352_p9 = pnand %p350_p8, %p347_p7 }
 0x1b2   :  { %355 = shalt.err (!%p352_p9)
}
 0x1b3   :  { %249 = dma.vmem_to_hbm [thread:$0]  %s247_s14, 32, %s434_s3, [#allocation5]  }
 0x1b4   :  { %360 = dma.done.wait [#allocation5], 32  }
 0x1b5   :  { %361 = vsyncadd [#allocation5], 4294967264 }
 0x1b6   :  { %253 = vsyncpa [#allocation4], 1 }
 0x1b7   :  { %254 = vsyncpa [#allocation7], 1 }
 0x1b8   :  { %255 = vsyncpa [#allocation5], 1 }

</bundles_post_ra>
